<compile_context>
chip_gen: v7x
topology: tpu7x:2x2x1
jax: 0.10.0
libtpu: 0.0.40
codegen_flags: <defaults>
</compile_context>

<pallas_src>
import jax
import jax.numpy as jnp
from jax.experimental import pallas as pl
from jax.experimental.pallas import tpu as pltpu

LANE = 128


def _round_up(x, m):
    return ((x + m - 1) // m) * m


def perception_kernel(x_ref, w1_ref, b1_ref, w2_ref, b2_ref, o_ref):
    # Cast x to the matmul operand dtype in-kernel (no-op when dtypes match).
    x = x_ref[...].astype(w1_ref.dtype)
    # Layer 1: (TM, in_dim) @ (in_dim, Hp) -> f32 accumulate on MXU.
    h = jnp.dot(x, w1_ref[...], preferred_element_type=jnp.float32)
    # Bias add + sigmoid in f32 (VPU + EUP; lane-dense hidden tile).
    h = jax.nn.sigmoid(h + b1_ref[...])
    # Layer 2: (TM, Hp) @ (Hp, out_dim) -> f32 accumulate on MXU.
    y = jnp.dot(h.astype(w2_ref.dtype), w2_ref[...],
                preferred_element_type=jnp.float32)
    y = jax.nn.sigmoid(y + b2_ref[...])
    # Store the real output width only (block last dim == full array dim).
    o_ref[...] = y.astype(o_ref.dtype)


def prepare_perception_params(w1, b1, w2, b2, *, matmul_dtype=None):
    """One-time parameter prep: lane-pad the hidden dim with zeros.

    Padded hidden activations are sigmoid(0) = 0.5, but the corresponding W2
    rows are zero, so they contribute nothing to the output.  Output columns
    are NOT padded (kept at out_dim).
    """
    in_dim, h_dim = w1.shape
    out_dim = w2.shape[1]
    mdt = jnp.dtype(w1.dtype) if matmul_dtype is None else jnp.dtype(matmul_dtype)

    h_pad = _round_up(h_dim, LANE)

    w1p = jnp.zeros((in_dim, h_pad), mdt).at[:, :h_dim].set(w1.astype(mdt))
    b1p = jnp.zeros((1, h_pad), jnp.float32).at[:, :h_dim].set(
        b1.astype(jnp.float32))
    w2p = jnp.zeros((h_pad, out_dim), mdt).at[:h_dim, :].set(w2.astype(mdt))
    b2p = b2.astype(jnp.float32).reshape(1, out_dim)
    return (w1p, b1p, w2p, b2p)


def perception_forward_prepared(x, params, *, block_m=1024, out_dtype=None):
    """x: [B, in_dim] -> [B, out_dim] using pre-padded params."""
    w1p, b1p, w2p, b2p = params
    B, in_dim = x.shape
    h_pad = w1p.shape[1]
    out_dim = w2p.shape[1]
    out_dt = jnp.dtype(x.dtype) if out_dtype is None else jnp.dtype(out_dtype)

    # Batch tile: multiple of 8 sublanes; for B > 8 force >= 2 grid steps so
    # the parallel batch axis shards across both TensorCores on v7x.
    if B <= 8:
        tm = B
    else:
        tm = min(block_m, _round_up(pl.cdiv(B, 2), 8))
    grid = (pl.cdiv(B, tm),)

    itemsize = lambda a: a.size * jnp.dtype(a.dtype).itemsize
    cost = pl.CostEstimate(
        flops=2 * B * (in_dim * h_pad + h_pad * out_dim),
        transcendentals=B * (h_pad + out_dim),
        bytes_accessed=(itemsize(x) + itemsize(w1p) + itemsize(b1p)
                        + itemsize(w2p) + itemsize(b2p)
                        + B * out_dim * out_dt.itemsize),
    )

    return pl.pallas_call(
        perception_kernel,
        out_shape=jax.ShapeDtypeStruct((B, out_dim), out_dt),
        grid_spec=pltpu.PrefetchScalarGridSpec(
            num_scalar_prefetch=0,
            grid=grid,
            in_specs=[
                # x tile streams over the batch axis (double-buffered).
                pl.BlockSpec((tm, in_dim), lambda i: (i, 0)),
                # Weights/biases: constant index_map -> fetched once, VMEM-resident.
                pl.BlockSpec((in_dim, h_pad), lambda i: (0, 0)),
                pl.BlockSpec((1, h_pad), lambda i: (0, 0)),
                pl.BlockSpec((h_pad, out_dim), lambda i: (0, 0)),
                pl.BlockSpec((1, out_dim), lambda i: (0, 0)),
            ],
            out_specs=pl.BlockSpec((tm, out_dim), lambda i: (i, 0)),
        ),
        compiler_params=pltpu.CompilerParams(
            # Batch tiles are independent -> shard across TensorCores (v7x megacore).
            dimension_semantics=("parallel",),
            # Explicit VMEM budget; comfortably within v7x's 64 MiB.
            vmem_limit_bytes=32 * 1024 * 1024,
        ),
        cost_estimate=cost,
    )(x, w1p, b1p, w2p, b2p)


def perception_forward(x, w1, b1, w2, b2, *, block_m=1024, matmul_dtype=None,
                       out_dtype=None):
    """Convenience wrapper matching Perception.forward (pads params per call;
    prefer prepare_perception_params() + perception_forward_prepared() in a
    real inference loop)."""
    params = prepare_perception_params(w1, b1, w2, b2, matmul_dtype=matmul_dtype)
    return perception_forward_prepared(x, params, block_m=block_m,
                                       out_dtype=out_dtype)


def perception_reference(x, w1, b1, w2, b2):
    h = jax.nn.sigmoid(x @ w1 + b1)
    return jax.nn.sigmoid(h @ w2 + b2)


if __name__ == "__main__":
    key = jax.random.PRNGKey(0)
    k_x, k_w1, k_b1, k_w2, k_b2, k_x2 = jax.random.split(key, 6)

    # Small shapes consistent with Perception(in_dim, h_dim, out_dim).
    batch, in_dim, h_dim, out_dim = 8, 32, 64, 16

    x = jax.random.normal(k_x, (batch, in_dim), dtype=jnp.float32)
    # Deterministic parameter init mirroring torch.randn in linear.__init__.
    w1 = jax.random.normal(k_w1, (in_dim, h_dim), dtype=jnp.float32)
    b1 = jax.random.normal(k_b1, (h_dim,), dtype=jnp.float32)
    w2 = jax.random.normal(k_w2, (h_dim, out_dim), dtype=jnp.float32)
    b2 = jax.random.normal(k_b2, (out_dim,), dtype=jnp.float32)

    ref = perception_reference(x, w1, b1, w2, b2)

    # f32 matmul path (exact vs reference), params prepared once.
    params_f32 = prepare_perception_params(w1, b1, w2, b2)
    out = perception_forward_prepared(x, params_f32)
    out = jax.block_until_ready(out)
    assert out.shape == (batch, out_dim)
    assert jnp.allclose(out, ref, atol=1e-5, rtol=1e-5), "f32 mismatch vs reference"

    # Multi-step grid path (B > 8 -> >= 2 grid steps, partial last block).
    x2 = jax.random.normal(k_x2, (48, in_dim), dtype=jnp.float32)
    ref2 = perception_reference(x2, w1, b1, w2, b2)
    out2 = jax.block_until_ready(perception_forward_prepared(x2, params_f32))
    assert out2.shape == (48, out_dim)
    assert jnp.allclose(out2, ref2, atol=1e-5, rtol=1e-5), "multi-tile mismatch"

    # bf16 MXU-operand path (v6e/v7x perf mode); x stays f32 and is cast
    # in-kernel.  Looser tolerance from bf16 operands.
    params_bf16 = prepare_perception_params(w1, b1, w2, b2,
                                            matmul_dtype=jnp.bfloat16)
    out_bf16 = perception_forward_prepared(x, params_bf16)
    out_bf16 = jax.block_until_ready(out_bf16)
    assert jnp.allclose(out_bf16, ref, atol=3e-2, rtol=3e-2), "bf16 mismatch vs reference"

    print("KERNEL_OK")
</pallas_src>

<mosaic_0001>
module attributes {stable_mosaic.version = 11 : i64} {
  func.func @perception_kernel(%arg0: i32, %arg1: memref<8x32xf32, #tpu.memory_space<vmem>>, %arg2: memref<32x128xf32, #tpu.memory_space<vmem>>, %arg3: memref<1x128xf32, #tpu.memory_space<vmem>>, %arg4: memref<128x16xf32, #tpu.memory_space<vmem>>, %arg5: memref<1x16xf32, #tpu.memory_space<vmem>>, %arg6: memref<8x16xf32, #tpu.memory_space<vmem>>) attributes {dimension_semantics = [#tpu.dimension_semantics<parallel>], iteration_bounds = array<i64: 1>, scalar_prefetch = 0 : i64, scratch_operands = 0 : i64, tpu.core_type = #tpu.core_type<tc>, window_params = [{transform_indices = @transform_0, window_bounds = array<i64: 8, 32>}, {pipeline_mode = #tpu.pipeline_mode<synchronous>, transform_indices = @transform_1, window_bounds = array<i64: 32, 128>}, {pipeline_mode = #tpu.pipeline_mode<synchronous>, transform_indices = @transform_2, window_bounds = array<i64: 1, 128>}, {pipeline_mode = #tpu.pipeline_mode<synchronous>, transform_indices = @transform_3, window_bounds = array<i64: 128, 16>}, {pipeline_mode = #tpu.pipeline_mode<synchronous>, transform_indices = @transform_4, window_bounds = array<i64: 1, 16>}, {transform_indices = @transform_5, window_bounds = array<i64: 8, 16>}]} {
    %c0 = arith.constant 0 : index
    %c0_0 = arith.constant 0 : index
    %0 = vector.load %arg1[%c0, %c0_0] : memref<8x32xf32, #tpu.memory_space<vmem>>, vector<8x32xf32>
    %c0_1 = arith.constant 0 : index
    %c0_2 = arith.constant 0 : index
    %1 = vector.load %arg2[%c0_1, %c0_2] : memref<32x128xf32, #tpu.memory_space<vmem>>, vector<32x128xf32>
    %cst = arith.constant dense<0.000000e+00> : vector<8x128xf32>
    %2 = tpu.matmul %0, %1, %cst {dimension_numbers = #tpu.dot_dimension_numbers<[1], [0], [0], [1], [0, 0, 1, 1], [], []>} : vector<8x32xf32>, vector<32x128xf32>, vector<8x128xf32> -> vector<8x128xf32>
    %c0_3 = arith.constant 0 : index
    %c0_4 = arith.constant 0 : index
    %3 = vector.load %arg3[%c0_3, %c0_4] : memref<1x128xf32, #tpu.memory_space<vmem>>, vector<1x128xf32>
    %4 = vector.broadcast %3 : vector<1x128xf32> to vector<8x128xf32>
    %5 = arith.addf %2, %4 : vector<8x128xf32>
    %6 = arith.negf %5 : vector<8x128xf32>
    %7 = math.exp %6 : vector<8x128xf32>
    %cst_5 = arith.constant 1.000000e+00 : f32
    %8 = vector.broadcast %cst_5 : f32 to vector<8x128xf32>
    %9 = arith.addf %8, %7 : vector<8x128xf32>
    %10 = arith.divf %8, %9 : vector<8x128xf32>
    %c0_6 = arith.constant 0 : index
    %c0_7 = arith.constant 0 : index
    %11 = vector.load %arg4[%c0_6, %c0_7] : memref<128x16xf32, #tpu.memory_space<vmem>>, vector<128x16xf32>
    %cst_8 = arith.constant dense<0.000000e+00> : vector<8x16xf32>
    %12 = tpu.matmul %10, %11, %cst_8 {dimension_numbers = #tpu.dot_dimension_numbers<[1], [0], [0], [1], [0, 0, 1, 1], [], []>} : vector<8x128xf32>, vector<128x16xf32>, vector<8x16xf32> -> vector<8x16xf32>
    %c0_9 = arith.constant 0 : index
    %c0_10 = arith.constant 0 : index
    %13 = vector.load %arg5[%c0_9, %c0_10] : memref<1x16xf32, #tpu.memory_space<vmem>>, vector<1x16xf32>
    %14 = vector.broadcast %13 : vector<1x16xf32> to vector<8x16xf32>
    %15 = arith.addf %12, %14 : vector<8x16xf32>
    %16 = arith.negf %15 : vector<8x16xf32>
    %17 = math.exp %16 : vector<8x16xf32>
    %cst_11 = arith.constant 1.000000e+00 : f32
    %18 = vector.broadcast %cst_11 : f32 to vector<8x16xf32>
    %19 = arith.addf %18, %17 : vector<8x16xf32>
    %20 = arith.divf %18, %19 : vector<8x16xf32>
    %c0_12 = arith.constant 0 : index
    %c0_13 = arith.constant 0 : index
    %21 = vector.load %arg6[%c0_12, %c0_13] : memref<8x16xf32, #tpu.memory_space<vmem>>, vector<8x16xf32>
    tpu.vector_store %arg6[%c0_12, %c0_13], %20 {strides = array<i32>} : memref<8x16xf32, #tpu.memory_space<vmem>>, vector<8x16xf32>,
    return
  }
  func.func @transform_0(%arg0: i32) -> (i32, i32) {
    %c0_i32 = arith.constant 0 : i32
    %c0_i32_0 = arith.constant 0 : i32
    return %arg0, %c0_i32 : i32, i32
  }
  func.func @transform_1(%arg0: i32) -> (i32, i32) {
    %c0_i32 = arith.constant 0 : i32
    %c0_i32_0 = arith.constant 0 : i32
    %c0_i32_1 = arith.constant 0 : i32
    return %c0_i32, %c0_i32_0 : i32, i32
  }
  func.func @transform_2(%arg0: i32) -> (i32, i32) {
    %c0_i32 = arith.constant 0 : i32
    %c0_i32_0 = arith.constant 0 : i32
    %c0_i32_1 = arith.constant 0 : i32
    return %c0_i32, %c0_i32_0 : i32, i32
  }
  func.func @transform_3(%arg0: i32) -> (i32, i32) {
    %c0_i32 = arith.constant 0 : i32
    %c0_i32_0 = arith.constant 0 : i32
    %c0_i32_1 = arith.constant 0 : i32
    return %c0_i32, %c0_i32_0 : i32, i32
  }
  func.func @transform_4(%arg0: i32) -> (i32, i32) {
    %c0_i32 = arith.constant 0 : i32
    %c0_i32_0 = arith.constant 0 : i32
    %c0_i32_1 = arith.constant 0 : i32
    return %c0_i32, %c0_i32_0 : i32, i32
  }
  func.func @transform_5(%arg0: i32) -> (i32, i32) {
    %c0_i32 = arith.constant 0 : i32
    %c0_i32_0 = arith.constant 0 : i32
    return %arg0, %c0_i32 : i32, i32
  }
}

</mosaic_0001>

<bundles_post_ra>
// kernel: tpu_custom_call.1
= control target key start
LH: loop header
LB: loop body
LE: loop exit
PB: predicated region body
PF: predicated region fallthrough
CT: control target
= control target key end

     0   :  { %v367_v3 = vmov 0.0|0.0   ;;  %vm368_vm0 = vmmov 0   ;;  %v369_v6 = vmov 0.0   ;;  %s482_s0 = inlined_call_operand.vmem [shape: f32[8,32], index: 0, kind: input, shape index: {}]   ;;  %s483_s1 = inlined_call_operand.vmem [shape: f32[32,128], index: 1, kind: input, shape index: {}]   ;;  %s484_s2 = inlined_call_operand.vmem [shape: f32[1,128], index: 2, kind: input, shape index: {}]   ;;  %s485_s3 = inlined_call_operand.vmem [shape: f32[128,16], index: 3, kind: input, shape index: {}]   ;;  %s486_s4 = inlined_call_operand.vmem [shape: f32[1,16], index: 4, kind: input, shape index: {}]   ;;  %s487_s5 = inlined_call_operand.hbm [shape: f32[8,16], index: 5, kind: output, shape index: {}]  }
   0x1   :  { %v22_v0 = vld [vmem:[%s483_s1] sm:$0xff]  ;;  %v23_v1 = vld [vmem:[%s483_s1 + $0x8] sm:$0xff]  ;;  %v24_v2 = vld [vmem:[%s483_s1 + $0x10] sm:$0xff]  ;;  %301 = vmatprep.subr.bf16.mxu0 %v367_v3  ;;  %263 = vmatprep.mubr.msk.f32.mxu0 %vm368_vm0, %v369_v6 }
   0x2   :  { %v302_v4 = vpack.c.bf16 %v23_v1, %v22_v0  ;;  %v25_v5 = vld [vmem:[%s483_s1 + $0x18] sm:$0xff]  ;;  %v113_v7 = vld [vmem:[%s485_s3] sm:$0xff]  ;;  %307 = vmatprep.subr.bf16.mxu1 %v367_v3  ;;  %v114_v8 = vld [vmem:[%s485_s3 + $0x8] sm:$0xff]  ;;  %298 = vmatprep.mubr.msk.f32.mxu1 %vm368_vm0, %v369_v6 }
   0x3   :  { %10 = vsyncpa [#allocation3], 0  ;;  %v305_v9 = vpack.c.bf16 %v25_v5, %v24_v2  ;;  %v308_v10 = vpack.c.bf16 %v114_v8, %v113_v7  ;;  %v21_v11 = vld [vmem:[%s482_s0] sm:$0xff]  ;;  %vm33_vm1 = vcmask 261120   ;;  %v115_v12 = vld [vmem:[%s485_s3 + $0x10] sm:$0xff]  ;;  %vm212_vm2 = vcmask 130048  }
   0x4   :  { %303 = vmatpush3.bf16.msra.mxu0 %v302_v4  ;;  %v116_v13 = vld [vmem:[%s485_s3 + $0x18] sm:$0xff]  ;;  %v117_v15 = vld [vmem:[%s485_s3 + $0x20] sm:$0xff]  ;;  %v118_v16 = vld [vmem:[%s485_s3 + $0x28] sm:$0xff] }
   0x5   :  { %304 = vmatprep.subr.bf16.mxu0 %v367_v3  ;;  %309 = vmatpush3.bf16.msra.mxu1 %v308_v10  ;;  %v311_v14 = vpack.c.bf16 %v116_v13, %v115_v12  ;;  %v314_v17 = vpack.c.bf16 %v118_v16, %v117_v15  ;;  %v119_v18 = vld [vmem:[%s485_s3 + $0x30] sm:$0xff]  ;;  %v120_v19 = vld [vmem:[%s485_s3 + $0x38] sm:$0xff]  ;;  %v121_v21 = vld [vmem:[%s485_s3 + $0x40] sm:$0xff] }
   0x6   :  { %310 = vmatprep.subr.bf16.mxu1 %v367_v3  ;;  %v317_v20 = vpack.c.bf16 %v120_v19, %v119_v18  ;;  %v122_v22 = vld [vmem:[%s485_s3 + $0x48] sm:$0xff]  ;;  %v123_v24 = vld [vmem:[%s485_s3 + $0x50] sm:$0xff]  ;;  %v124_v25 = vld [vmem:[%s485_s3 + $0x58] sm:$0xff] }
   0x7   :  { %v320_v23 = vpack.c.bf16 %v122_v22, %v121_v21  ;;  %v323_v26 = vpack.c.bf16 %v124_v25, %v123_v24  ;;  %v125_v27 = vld [vmem:[%s485_s3 + $0x60] sm:$0xff]  ;;  %v126_v28 = vld [vmem:[%s485_s3 + $0x68] sm:$0xff]  ;;  %v127_v30 = vld [vmem:[%s485_s3 + $0x70] sm:$0xff] }
   0x8   :  { %306 = vmatpush3.bf16.msra.mxu0 %v305_v9  ;;  %v326_v29 = vpack.c.bf16 %v126_v28, %v125_v27  ;;  %v128_v31 = vld [vmem:[%s485_s3 + $0x78] sm:$0xff]  ;;  %v228_v33 = vld [vmem:[%s484_s2] ss:$0 sm:$0xff]  ;;  %s370_s2 = smov [#allocation2]  }
   0x9   :  { %312 = vmatpush3.bf16.msra.mxu1 %v311_v14  ;;  %v329_v32 = vpack.c.bf16 %v128_v31, %v127_v30  ;;  %v231_v41 = vld [vmem:[%s486_s4] ss:$0 sm:$0xff]  ;;  %s220_s10 = sshll.u32 %s370_s2, 4  ;;  %s221_s10 = int_to_ptr.vmem [resolvable:$true] %s220_s10 }
   0xa   :  { %313 = vmatprep.subr.bf16.mxu1 %v367_v3  ;;  %s343_s11 = scalar_lea.vmem %s221_s10, 128  ;;  %p348_p1 = scmp.lt.s32.totalorder %s221_s10, %s221_s10 }
   0xb   :  { %264 = vmatmul.mubr.msk.f32.vlgmr.msra.gmra.mrb[0].mxu0 %vm33_vm1, %v21_v11  ;;  %p344_p0 = scmp.ne.s32.totalorder %s221_s10, %s343_s11  ;;  %p349_p2 = scmp.lt.s32.totalorder %s343_s11, %s343_s11 }
   0xd   :  { %315 = vmatpush3.bf16.msra.mxu1 %v314_v17  ;;  %p350_p3 = por %p349_p2, %p348_p1 }
   0xe   :  { %316 = vmatprep.subr.bf16.mxu1 %v367_v3 }
   0xf   :  { %p351_p4 = pnand %p350_p3, %p344_p0 }
  0x11   :  { %318 = vmatpush3.bf16.msra.mxu1 %v317_v20 }
  0x12   :  { %319 = vmatprep.subr.bf16.mxu1 %v367_v3 }
  0x15   :  { %321 = vmatpush3.bf16.msra.mxu1 %v320_v23 }
  0x16   :  { %322 = vmatprep.subr.bf16.mxu1 %v367_v3 }
  0x19   :  { %324 = vmatpush3.bf16.msra.mxu1 %v323_v26 }
  0x1a   :  { %325 = vmatprep.subr.bf16.mxu1 %v367_v3 }
  0x1d   :  { %327 = vmatpush3.bf16.msra.mxu1 %v326_v29 }
  0x1e   :  { %328 = vmatprep.subr.bf16.mxu1 %v367_v3 }
  0x21   :  { %330 = vmatpush3.bf16.msra.mxu1 %v329_v32 }
  0xde   :  { %v103_v34 = vpop.f32.mrb[0].mxu0 }
  0xdf   :  { %v104_v35 = vadd.f32 %v228_v33, %v103_v34  ;;  %v265_v36 = vpop.f32.mrb[1].mxu0 }
  0xe1   :  { %v230_v37 = vmul.f32 -1.442695, %v104_v35 }
  0xe3   :  { %335 = vpow2.f32 %v230_v37 }
  0xed   :  { %v336_v38 = vpop.eup %335 }
  0xee   :  { %v110_v39 = vadd.f32 1.0, %v336_v38 }
  0xf0   :  { %337 = vrcp.f32 %v110_v39 }
  0xfa   :  { %v338_v40 = vpop.eup %337 }
  0xfb   :  { %299 = vmatmul.mubr.f32.vlgmr.msra.gmra.mrb[0].mxu1 %v338_v40 }
 0x1ce   :  { %v202_v42 = vpop.f32.mrb[0].mxu1 }
 0x1cf   :  { %v203_v43 = vadd.f32 %v231_v41, %v202_v42  ;;  %v300_v44 = vpop.f32.mrb[1].mxu1 }
 0x1d1   :  { %v232_v45 = vmul.f32 -1.442695, %v203_v43 }
 0x1d3   :  { %339 = vpow2.f32 %v232_v45 }
 0x1dd   :  { %v340_v46 = vpop.eup %339 }
 0x1de   :  { %v209_v47 = vadd.f32 1.0, %v340_v46 }
 0x1e0   :  { %341 = vrcp.f32 %v209_v47 }
 0x1ea   :  { %v342_v48 = vpop.eup %341 }
 0x1eb   :  { %213 = vst.msk [vmem:[#allocation2] sm:$0xff] %vm212_vm2, %v342_v48 }
 0x1ec   :  { %354 = shalt.err (!%p351_p4)
}
 0x1ed   :  { %s355_s13 = scalar_lea.hbm %s487_s5, 128 }
 0x1ee   :  { %p356_p5 = scmp.ne.s32.totalorder %s487_s5, %s355_s13  ;;  %p359_p6 = scmp.lt.u32.totalorder %s355_s13, %s487_s5 }
 0x1f0   :  { %p361_p7 = pnand %p359_p6, %p356_p5 }
 0x1f2   :  { %364 = shalt.err (!%p361_p7)
}
 0x1f3   :  { %223 = dma.vmem_to_hbm [thread:$0]  %s221_s10, 128, %s487_s5, [#allocation3]  }
 0x1f4   :  { %365 = dma.done.wait [#allocation3], 128  }
 0x1f5   :  { %366 = vsyncadd [#allocation3], 4294967168 }
 0x1f6   :  { %227 = vsyncpa [#allocation3], 1 }

</bundles_post_ra>
